<compile_context>
chip_gen: v7x
topology: tpu7x:2x2x1
jax: 0.10.0
libtpu: 0.0.40
codegen_flags: <defaults>
</compile_context>

<pallas_src>
import jax
import jax.numpy as jnp
from jax import lax
from jax.experimental import pallas as pl
from jax.experimental.pallas import tpu as pltpu


def _round_up(x, m):
    return (x + m - 1) // m * m


def _autoencoder_kernel(x_ref, w1_ref, b1_ref, wft_ref, bft_ref, out_ref):
    """Fused encoder layer-1 + folded (encoder layer-2 ∘ fc) head + sigmoid.

    x_ref   : [TB, D_in]  bf16   batch tile, features on the lane axis
    w1_ref  : [D_in, H]   bf16   VMEM-resident across grid steps
    b1_ref  : [1, H]      f32
    wft_ref : [O, H]      bf16   = (w2 @ wf).T        (latent Linear ∘ fc fold)
    bft_ref : [O, 1]      f32    = (b2 @ wf + bf).T
    out_ref : [O, TB]     f32    batch on the lane axis -> lane-dense store
    """
    # Layer 1: Linear + ReLU.  bf16 MXU operands, f32 accumulate, f32 epilogue.
    h = jnp.dot(x_ref[...], w1_ref[...], preferred_element_type=jnp.float32)
    h = jnp.maximum(h + b1_ref[...], 0.0)                         # [TB, H] f32

    # Folded head: logits^T = wft @ h^T, expressed as a trans-B dot_general so
    # no explicit transpose is materialized and the output is lane-dense.
    logits = lax.dot_general(
        wft_ref[...], h.astype(jnp.bfloat16),
        dimension_numbers=(((1,), (1,)), ((), ())),
        preferred_element_type=jnp.float32)                       # [O, TB] f32

    # decoder(latent) is discarded in the reference forward -> dead compute,
    # intentionally skipped.
    out_ref[...] = jax.nn.sigmoid(logits + bft_ref[...])


def autoencoder_forward(x, params, *, batch_tile=512):
    """Fused Pallas forward. Returns sigmoid(fc(encoder(x))).squeeze()."""
    w1, b1, w2, b2, wf, bf = params
    B, D_in = x.shape
    H = w1.shape[1]
    O = wf.shape[1]

    # ---- one-time algebraic fold of latent Linear + fc head (plain XLA) ----
    wft = (w2 @ wf).T                                # [O, H]
    bft = (b2 @ wf + bf).T                           # [O, 1]

    # ---- batch tiling: TB is a multiple of 128 so output stores are
    #      lane-dense; pad the batch up to a whole number of tiles. ----------
    TB = _round_up(min(batch_tile, _round_up(B, 128)), 128)
    B_pad = _round_up(B, TB)
    if B_pad != B:
        x = jnp.pad(x, ((0, B_pad - B), (0, 0)))

    # bf16 MXU operands; biases and the elementwise epilogue stay f32.
    x_bf = x.astype(jnp.bfloat16)
    w1_bf = w1.astype(jnp.bfloat16)
    wft_bf = wft.astype(jnp.bfloat16)
    b1_f = b1.astype(jnp.float32)
    bft_f = bft.astype(jnp.float32)

    out = pl.pallas_call(
        _autoencoder_kernel,
        out_shape=jax.ShapeDtypeStruct((O, B_pad), jnp.float32),
        grid_spec=pltpu.PrefetchScalarGridSpec(
            num_scalar_prefetch=0,
            grid=(B_pad // TB,),
            in_specs=[
                pl.BlockSpec((TB, D_in), lambda i: (i, 0)),   # x batch tile
                pl.BlockSpec((D_in, H), lambda i: (0, 0)),    # w1 (resident)
                pl.BlockSpec((1, H), lambda i: (0, 0)),       # b1 (resident)
                pl.BlockSpec((O, H), lambda i: (0, 0)),       # folded weight
                pl.BlockSpec((O, 1), lambda i: (0, 0)),       # folded bias
            ],
            out_specs=pl.BlockSpec((O, TB), lambda i: (0, i)),
        ),
        compiler_params=pltpu.CompilerParams(
            dimension_semantics=("parallel",),    # batch tiles independent
            vmem_limit_bytes=32 << 20,            # explicit; safe on v7x 64MiB
        ),
    )(x_bf, w1_bf, b1_f, wft_bf, bft_f)

    # Undo pad + layout: [O, B_pad] -> [B, O], then torch-style .squeeze()
    # (drops ALL size-1 dims; also drops batch when B == 1, matching torch).
    out = out[:, :B].T
    return jnp.squeeze(out)


def init_params(key, input_dim, hidden_dim, latent_dim, output_dim):
    """Deterministic synthetic parameters (same shapes as the nn.Module)."""
    ks = jax.random.split(key, 6)
    scale = 0.1
    # weights stored as [in_features, out_features] (pre-transposed vs. torch)
    w1 = scale * jax.random.normal(ks[0], (input_dim, hidden_dim), jnp.float32)
    b1 = scale * jax.random.normal(ks[1], (1, hidden_dim), jnp.float32)
    w2 = scale * jax.random.normal(ks[2], (hidden_dim, latent_dim), jnp.float32)
    b2 = scale * jax.random.normal(ks[3], (1, latent_dim), jnp.float32)
    wf = scale * jax.random.normal(ks[4], (latent_dim, output_dim), jnp.float32)
    bf = scale * jax.random.normal(ks[5], (1, output_dim), jnp.float32)
    return (w1, b1, w2, b2, wf, bf)


if __name__ == "__main__":
    # Small shapes consistent with the module's forward.
    batch, input_dim, hidden_dim, latent_dim, output_dim = 8, 32, 32, 16, 1

    key = jax.random.PRNGKey(0)
    kx, kp = jax.random.split(key)
    x = jax.random.normal(kx, (batch, input_dim), jnp.float32)
    params = init_params(kp, input_dim, hidden_dim, latent_dim, output_dim)

    out = autoencoder_forward(x, params)
    out = jax.block_until_ready(out)

    # Sanity check against a pure-JAX f32 reference of the same math.
    # Tolerance accounts for bf16 MXU operands + the (w2@wf) re-association.
    w1, b1, w2, b2, wf, bf = params
    h_ref = jnp.maximum(x @ w1 + b1, 0.0)
    lat_ref = h_ref @ w2 + b2
    ref = jnp.squeeze(jax.nn.sigmoid(lat_ref @ wf + bf))
    assert out.shape == (batch,), out.shape
    assert jnp.allclose(out, ref, atol=2e-2), (
        "mismatch vs reference: max abs diff = "
        f"{float(jnp.max(jnp.abs(out - ref)))}")

    print("KERNEL_OK")
</pallas_src>

<mosaic_0001>
module attributes {stable_mosaic.version = 11 : i64} {
  func.func @_autoencoder_kernel(%arg0: i32, %arg1: memref<128x32xbf16, #tpu.memory_space<vmem>>, %arg2: memref<32x32xbf16, #tpu.memory_space<vmem>>, %arg3: memref<1x32xf32, #tpu.memory_space<vmem>>, %arg4: memref<1x32xbf16, #tpu.memory_space<vmem>>, %arg5: memref<1x1xf32, #tpu.memory_space<vmem>>, %arg6: memref<1x128xf32, #tpu.memory_space<vmem>>) attributes {dimension_semantics = [#tpu.dimension_semantics<parallel>], iteration_bounds = array<i64: 1>, scalar_prefetch = 0 : i64, scratch_operands = 0 : i64, tpu.core_type = #tpu.core_type<tc>, window_params = [{transform_indices = @transform_0, window_bounds = array<i64: 128, 32>}, {pipeline_mode = #tpu.pipeline_mode<synchronous>, transform_indices = @transform_1, window_bounds = array<i64: 32, 32>}, {pipeline_mode = #tpu.pipeline_mode<synchronous>, transform_indices = @transform_2, window_bounds = array<i64: 1, 32>}, {pipeline_mode = #tpu.pipeline_mode<synchronous>, transform_indices = @transform_3, window_bounds = array<i64: 1, 32>}, {pipeline_mode = #tpu.pipeline_mode<synchronous>, transform_indices = @transform_4, window_bounds = array<i64: 1, 1>}, {transform_indices = @transform_5, window_bounds = array<i64: 1, 128>}]} {
    %c0 = arith.constant 0 : index
    %c0_0 = arith.constant 0 : index
    %0 = vector.load %arg1[%c0, %c0_0] : memref<128x32xbf16, #tpu.memory_space<vmem>>, vector<128x32xbf16>
    %c0_1 = arith.constant 0 : index
    %c0_2 = arith.constant 0 : index
    %1 = vector.load %arg2[%c0_1, %c0_2] : memref<32x32xbf16, #tpu.memory_space<vmem>>, vector<32x32xbf16>
    %cst = arith.constant dense<0.000000e+00> : vector<128x32xf32>
    %2 = tpu.matmul %0, %1, %cst {dimension_numbers = #tpu.dot_dimension_numbers<[1], [0], [0], [1], [0, 0, 1, 1], [], []>} : vector<128x32xbf16>, vector<32x32xbf16>, vector<128x32xf32> -> vector<128x32xf32>
    %c0_3 = arith.constant 0 : index
    %c0_4 = arith.constant 0 : index
    %3 = vector.load %arg3[%c0_3, %c0_4] : memref<1x32xf32, #tpu.memory_space<vmem>>, vector<1x32xf32>
    %4 = vector.broadcast %3 : vector<1x32xf32> to vector<128x32xf32>
    %5 = arith.addf %2, %4 : vector<128x32xf32>
    %cst_5 = arith.constant 0.000000e+00 : f32
    %6 = vector.broadcast %cst_5 : f32 to vector<128x32xf32>
    %7 = arith.maximumf %5, %6 : vector<128x32xf32>
    %c0_6 = arith.constant 0 : index
    %c0_7 = arith.constant 0 : index
    %8 = vector.load %arg4[%c0_6, %c0_7] : memref<1x32xbf16, #tpu.memory_space<vmem>>, vector<1x32xbf16>
    %9 = arith.truncf %7 : vector<128x32xf32> to vector<128x32xbf16>
    %cst_8 = arith.constant dense<0.000000e+00> : vector<1x128xf32>
    %10 = tpu.matmul %8, %9, %cst_8 {dimension_numbers = #tpu.dot_dimension_numbers<[1], [1], [0], [0], [0, 0, 1, 0], [], []>} : vector<1x32xbf16>, vector<128x32xbf16>, vector<1x128xf32> -> vector<1x128xf32>
    %c0_9 = arith.constant 0 : index
    %c0_10 = arith.constant 0 : index
    %11 = vector.load %arg5[%c0_9, %c0_10] : memref<1x1xf32, #tpu.memory_space<vmem>>, vector<1x1xf32>
    %12 = vector.broadcast %11 : vector<1x1xf32> to vector<1x128xf32>
    %13 = arith.addf %10, %12 : vector<1x128xf32>
    %14 = arith.negf %13 : vector<1x128xf32>
    %15 = math.exp %14 : vector<1x128xf32>
    %cst_11 = arith.constant 1.000000e+00 : f32
    %16 = vector.broadcast %cst_11 : f32 to vector<1x128xf32>
    %17 = arith.addf %16, %15 : vector<1x128xf32>
    %18 = arith.divf %16, %17 : vector<1x128xf32>
    %c0_12 = arith.constant 0 : index
    %c0_13 = arith.constant 0 : index
    %19 = vector.load %arg6[%c0_12, %c0_13] : memref<1x128xf32, #tpu.memory_space<vmem>>, vector<1x128xf32>
    tpu.vector_store %arg6[%c0_12, %c0_13], %18 {strides = array<i32>} : memref<1x128xf32, #tpu.memory_space<vmem>>, vector<1x128xf32>,
    return
  }
  func.func @transform_0(%arg0: i32) -> (i32, i32) {
    %c0_i32 = arith.constant 0 : i32
    %c0_i32_0 = arith.constant 0 : i32
    return %arg0, %c0_i32 : i32, i32
  }
  func.func @transform_1(%arg0: i32) -> (i32, i32) {
    %c0_i32 = arith.constant 0 : i32
    %c0_i32_0 = arith.constant 0 : i32
    %c0_i32_1 = arith.constant 0 : i32
    return %c0_i32, %c0_i32_0 : i32, i32
  }
  func.func @transform_2(%arg0: i32) -> (i32, i32) {
    %c0_i32 = arith.constant 0 : i32
    %c0_i32_0 = arith.constant 0 : i32
    %c0_i32_1 = arith.constant 0 : i32
    return %c0_i32, %c0_i32_0 : i32, i32
  }
  func.func @transform_3(%arg0: i32) -> (i32, i32) {
    %c0_i32 = arith.constant 0 : i32
    %c0_i32_0 = arith.constant 0 : i32
    %c0_i32_1 = arith.constant 0 : i32
    return %c0_i32, %c0_i32_0 : i32, i32
  }
  func.func @transform_4(%arg0: i32) -> (i32, i32) {
    %c0_i32 = arith.constant 0 : i32
    %c0_i32_0 = arith.constant 0 : i32
    %c0_i32_1 = arith.constant 0 : i32
    return %c0_i32, %c0_i32_0 : i32, i32
  }
  func.func @transform_5(%arg0: i32) -> (i32, i32) {
    %c0_i32 = arith.constant 0 : i32
    %c0_i32_0 = arith.constant 0 : i32
    return %c0_i32, %arg0 : i32, i32
  }
}

</mosaic_0001>

<bundles_post_ra>
// kernel: tpu_custom_call.1
= control target key start
LH: loop header
LB: loop body
LE: loop exit
PB: predicated region body
PF: predicated region fallthrough
CT: control target
= control target key end

     0   :  { %s582_s0 = inlined_call_operand.vmem [shape: bf16[128,32], index: 0, kind: input, shape index: {}]   ;;  %s583_s1 = inlined_call_operand.vmem [shape: bf16[32,32], index: 1, kind: input, shape index: {}]   ;;  %s584_s2 = inlined_call_operand.vmem [shape: f32[1,32], index: 2, kind: input, shape index: {}]   ;;  %s585_s3 = inlined_call_operand.vmem [shape: bf16[1,32], index: 3, kind: input, shape index: {}]   ;;  %s586_s4 = inlined_call_operand.<no memory space> [shape: f32[1,1], index: 4, kind: input, shape index: {}]   ;;  %s587_s5 = inlined_call_operand.hbm [shape: f32[1,128], index: 5, kind: output, shape index: {}]  }
   0x1   :  { %v10_v0 = vstv %s586_s4 }
   0x2   :  { %11 = vst [vmem:[#allocation2] sm:$0x1] %v10_v0 }
   0x3   :  { %v433_v1 = vld [vmem:[%s583_s1] sm:$0xff]   ;;  %v434_v2 = vld [vmem:[%s583_s1 + $0x8] sm:$0xff]   ;;  %vm103_vm0 = vcmask 261120   ;;  %v437_v5 = vld [vmem:[%s582_s0 + $0x10] sm:$0xff]  }
   0x4   :  { %388 = vmatprep.subr.bf16.mxu0 %v433_v1  ;;  %v435_v3 = vld [vmem:[%s582_s0] sm:$0xff]   ;;  %v436_v4 = vld [vmem:[%s582_s0 + $0x8] sm:$0xff]  }
   0x5   :  { %389 = vmatpush3.bf16.msra.mxu0 %v433_v1  ;;  %392 = vmatprep.mubr.msk.bf16.mxu0 %vm103_vm0, %v435_v3 }
   0x6   :  { %390 = vmatprep.subr.bf16.mxu0 %v434_v2 }
   0x9   :  { %391 = vmatpush3.bf16.msra.mxu0 %v434_v2 }
   0xc   :  { %393 = vmatmul.mubr.msk.bf16.vlgmr.msra.gmra.mrb[0].mxu0 %vm103_vm0, %v436_v4 }
   0xd   :  { %12 = vsyncpa [#allocation4], 0  ;;  %396 = vmatprep.mubr.msk.bf16.mxu0 %vm103_vm0, %v437_v5  ;;  %v438_v6 = vld [vmem:[%s582_s0 + $0x18] sm:$0xff]   ;;  %v439_v7 = vld [vmem:[%s582_s0 + $0x20] sm:$0xff]   ;;  %v471_v11 = vmov 0.0   ;;  %vm472_vm1 = vmmov 0  }
   0xe   :  { %v440_v8 = vld [vmem:[%s582_s0 + $0x28] sm:$0xff]   ;;  %v441_v9 = vld [vmem:[%s582_s0 + $0x30] sm:$0xff]   ;;  %v442_v10 = vld [vmem:[%s582_s0 + $0x38] sm:$0xff]   ;;  %408 = vmatprep.subr.bf16.mxu1 %v471_v11  ;;  %424 = vmatprep.mubr.msk.bf16.mxu1 %vm472_vm1, %v471_v11  ;;  %v473_v13 = vmov 0   ;;  %s474_s15 = smov [#allocation3]  }
   0xf   :  { %v250_v12 = vld [vmem:[#allocation2] sm:$0x1]  ;;  %432 = vset.pattern.permute.xlu0 %v473_v13  ;;  %s340_s16 = sshll.u32 %s474_s15, 4  ;;  %s341_s16 = int_to_ptr.vmem [resolvable:$true] %s340_s16 }
  0x10   :  { %253 = vperm.xlu0 %432, %v250_v12   ;;  %v348_v14 = vld [vmem:[%s584_s2] ss:$0 sm:$0xff]  ;;  %s451_s17 = scalar_lea.vmem %s341_s16, 32  ;;  %p452_p1 = scmp.lt.s32.totalorder %s341_s16, %s341_s16 }
  0x14   :  { %397 = vmatmul.mubr.msk.bf16.gmra.mrb[4].mxu0 %vm103_vm0, %v438_v6 }
  0x15   :  { %400 = vmatprep.mubr.msk.bf16.mxu0 %vm103_vm0, %v439_v7 }
  0x1c   :  { %401 = vmatmul.mubr.msk.bf16.gmra.mrb[8].mxu0 %vm103_vm0, %v440_v8 }
  0x1d   :  { %404 = vmatprep.mubr.msk.bf16.mxu0 %vm103_vm0, %v441_v9 }
  0x24   :  { %405 = vmatmul.mubr.msk.bf16.gmra.mrb[12].mxu0 %vm103_vm0, %v442_v10 }
  0xdf   :  { %v394_v15 = vpop.f32.mrb[0].mxu0 }
  0xe0   :  { %v171_v16 = vadd.f32 %v394_v15, %v348_v14  ;;  %v162_v17 = vpop.f32.mrb[1].mxu0 }
  0xe1   :  { %v163_v18 = vadd.f32 %v348_v14, %v162_v17  ;;  %v395_v19 = vpop.f32.mrb[2].mxu0  ;;  %v256_v17 = vlaneseq }
  0xe2   :  { %v174_v20 = vadd.f32 %v395_v19, %v348_v14  ;;  %v165_v21 = vpop.f32.mrb[3].mxu0  ;;  %v227_v23 = vmax.f32 %v171_v16, 0.0  ;;  %v241_v16 = vld [vmem:[%s585_s3] sm:$0x1]  ;;  %s447_s3 = scalar_lea.vmem %s341_s16, 16 }
  0xe3   :  { %v166_v22 = vadd.f32 %v348_v14, %v165_v21  ;;  %v225_v25 = vmax.f32 %v163_v18, 0.0  ;;  %v257_v18 = vshrl.u32 %v256_v17, 7  ;;  %p448_p0 = scmp.ne.s32.totalorder %s341_s16, %s447_s3  ;;  %p453_p2 = scmp.lt.s32.totalorder %s451_s17, %s447_s3 }
  0xe4   :  { %v228_v24 = vmax.f32 %v174_v20, 0.0  ;;  %v254_v20 = vpop.permute.xlu0 %253 }
  0xe5   :  { %v226_v26 = vmax.f32 %v166_v22, 0.0  ;;  %v258_v19 = vsub.s32 0, %v257_v18  ;;  %p454_p3 = por %p453_p2, %p452_p1 }
  0xe6   :  { %v243_v27 = vpack.c.bf16 %v228_v24, %v227_v23 }
  0xe7   :  { %v242_v28 = vpack.c.bf16 %v226_v26, %v225_v25  ;;  %v398_v29 = vpop.f32.mrb[4].mxu0  ;;  %v259_v21 = vrot.slane %v254_v20, %v258_v19  ;;  %p455_p4 = pnand %p454_p3, %p448_p0 }
  0xe8   :  { %v187_v30 = vadd.f32 %v398_v29, %v348_v14  ;;  %v178_v31 = vpop.f32.mrb[5].mxu0  ;;  %v267_v47 = vsel %vm103_vm0, %v243_v27, 0 }
  0xe9   :  { %v264_v32 = vsel %vm103_vm0, %v242_v28, 0  ;;  %v179_v33 = vadd.f32 %v348_v14, %v178_v31  ;;  %v399_v34 = vpop.f32.mrb[6].mxu0 }
  0xea   :  { %409 = vmatpush3.bf16.xpose.msra.mxu1 %v264_v32  ;;  %v231_v35 = vmax.f32 %v187_v30, 0.0  ;;  %v190_v36 = vadd.f32 %v399_v34, %v348_v14  ;;  %v181_v37 = vpop.f32.mrb[7].mxu0 }
  0xeb   :  { %v229_v38 = vmax.f32 %v179_v33, 0.0  ;;  %v182_v39 = vadd.f32 %v348_v14, %v181_v37  ;;  %410 = vmatprep.subr.bf16.mxu1 %v471_v11 }
  0xec   :  { %v232_v40 = vmax.f32 %v190_v36, 0.0 }
  0xed   :  { %v230_v41 = vmax.f32 %v182_v39, 0.0 }
  0xee   :  { %v245_v42 = vpack.c.bf16 %v232_v40, %v231_v35 }
  0xef   :  { %v244_v43 = vpack.c.bf16 %v230_v41, %v229_v38  ;;  %v402_v44 = vpop.f32.mrb[8].mxu0 }
  0xf0   :  { %v203_v45 = vadd.f32 %v402_v44, %v348_v14  ;;  %v194_v46 = vpop.f32.mrb[9].mxu0  ;;  %v273_v10 = vsel %vm103_vm0, %v245_v42, 0 }
  0xf1   :  { %v195_v48 = vadd.f32 %v348_v14, %v194_v46  ;;  %v403_v49 = vpop.f32.mrb[10].mxu0  ;;  %v270_v62 = vsel %vm103_vm0, %v244_v43, 0 }
  0xf2   :  { %411 = vmatpush3.bf16.xpose.msra.mxu1 %v267_v47  ;;  %v235_v50 = vmax.f32 %v203_v45, 0.0  ;;  %v206_v51 = vadd.f32 %v403_v49, %v348_v14  ;;  %v197_v52 = vpop.f32.mrb[11].mxu0 }
  0xf3   :  { %412 = vmatprep.subr.bf16.mxu1 %v471_v11  ;;  %v233_v53 = vmax.f32 %v195_v48, 0.0  ;;  %v198_v54 = vadd.f32 %v348_v14, %v197_v52 }
  0xf4   :  { %v236_v55 = vmax.f32 %v206_v51, 0.0 }
  0xf5   :  { %v234_v56 = vmax.f32 %v198_v54, 0.0 }
  0xf6   :  { %v247_v57 = vpack.c.bf16 %v236_v55, %v235_v50 }
  0xf7   :  { %v246_v58 = vpack.c.bf16 %v234_v56, %v233_v53  ;;  %v406_v59 = vpop.f32.mrb[12].mxu0 }
  0xf8   :  { %v219_v60 = vadd.f32 %v406_v59, %v348_v14  ;;  %v210_v61 = vpop.f32.mrb[13].mxu0  ;;  %v279_v13 = vsel %vm103_vm0, %v247_v57, 0 }
  0xf9   :  { %v211_v63 = vadd.f32 %v348_v14, %v210_v61  ;;  %v407_v0 = vpop.f32.mrb[14].mxu0  ;;  %v276_v12 = vsel %vm103_vm0, %v246_v58, 0 }
  0xfa   :  { %413 = vmatpush3.bf16.xpose.msra.mxu1 %v270_v62  ;;  %v239_v1 = vmax.f32 %v219_v60, 0.0  ;;  %v222_v2 = vadd.f32 %v407_v0, %v348_v14  ;;  %v213_v3 = vpop.f32.mrb[15].mxu0 }
  0xfb   :  { %414 = vmatprep.subr.bf16.mxu1 %v471_v11  ;;  %v237_v4 = vmax.f32 %v211_v63, 0.0  ;;  %v214_v5 = vadd.f32 %v348_v14, %v213_v3 }
  0xfc   :  { %v240_v6 = vmax.f32 %v222_v2, 0.0 }
  0xfd   :  { %v238_v7 = vmax.f32 %v214_v5, 0.0 }
  0xfe   :  { %v249_v8 = vpack.c.bf16 %v240_v6, %v239_v1 }
  0xff   :  { %v248_v9 = vpack.c.bf16 %v238_v7, %v237_v4 }
 0x100   :  { %v285_v15 = vsel %vm103_vm0, %v249_v8, 0 }
 0x101   :  { %v282_v14 = vsel %vm103_vm0, %v248_v9, 0 }
 0x102   :  { %415 = vmatpush3.bf16.xpose.msra.mxu1 %v273_v10 }
 0x103   :  { %416 = vmatprep.subr.bf16.mxu1 %v471_v11 }
 0x10a   :  { %417 = vmatpush3.bf16.xpose.msra.mxu1 %v276_v12 }
 0x10b   :  { %418 = vmatprep.subr.bf16.mxu1 %v471_v11 }
 0x112   :  { %419 = vmatpush3.bf16.xpose.msra.mxu1 %v279_v13 }
 0x113   :  { %420 = vmatprep.subr.bf16.mxu1 %v471_v11 }
 0x11a   :  { %421 = vmatpush3.bf16.xpose.msra.mxu1 %v282_v14 }
 0x11b   :  { %422 = vmatprep.subr.bf16.mxu1 %v471_v11 }
 0x122   :  { %423 = vmatpush3.bf16.xpose.msra.mxu1 %v285_v15 }
 0x129   :  { %425 = vmatmul.mubr.msk.bf16.vlgmr.msra.gmra.mrb[0].mxu1 %vm103_vm0, %v241_v16 }
 0x1fc   :  { %v321_v22 = vpop.f32.mrb[0].mxu1 }
 0x1fd   :  { %v322_v23 = vadd.f32 %v321_v22, %v259_v21  ;;  %v426_v24 = vpop.f32.mrb[1].mxu1 }
 0x1fe   :  { %v324_v25 = vpop.f32.mrb[2].mxu1 }
 0x1ff   :  { %v368_v26 = vmul.f32 -1.442695, %v322_v23  ;;  %v427_v11 = vpop.f32.mrb[3].mxu1 }
 0x201   :  { %443 = vpow2.f32 %v368_v26 }
 0x20b   :  { %v444_v27 = vpop.eup %443 }
 0x20c   :  { %v330_v28 = vadd.f32 1.0, %v444_v27 }
 0x20e   :  { %445 = vrcp.f32 %v330_v28 }
 0x218   :  { %v446_v29 = vpop.eup %445 }
 0x219   :  { %333 = vst [vmem:[#allocation3] sm:$0x1] %v446_v29 }
 0x21a   :  { %458 = shalt.err (!%p455_p4)
}
 0x21b   :  { %s459_s20 = scalar_lea.hbm %s587_s5, 16 }
 0x21c   :  { %p460_p5 = scmp.ne.s32.totalorder %s587_s5, %s459_s20  ;;  %p463_p6 = scmp.lt.u32.totalorder %s459_s20, %s587_s5 }
 0x21e   :  { %p465_p7 = pnand %p463_p6, %p460_p5 }
 0x220   :  { %468 = shalt.err (!%p465_p7)
}
 0x221   :  { %343 = dma.vmem_to_hbm [thread:$0]  %s341_s16, 16, %s587_s5, [#allocation4]  }
 0x222   :  { %469 = dma.done.wait [#allocation4], 16  }
 0x223   :  { %470 = vsyncadd [#allocation4], 4294967280 }
 0x224   :  { %347 = vsyncpa [#allocation4], 1 }

</bundles_post_ra>
